<compile_context>
chip_gen: v7x
topology: tpu7x:2x2x1
jax: 0.10.0
libtpu: 0.0.40
codegen_flags: <defaults>
</compile_context>

<pallas_src>
import jax
import jax.numpy as jnp
from jax.experimental import pallas as pl
from jax.experimental.pallas import tpu as pltpu


def _split_slab_kernel(x_ref, slab_ref):
    # x_ref:    (TN, C, HW)  one batch-tile of v1 with spatial dims flattened
    # slab_ref: (C, TN, HW)  channel-major slab; slab[c] == v1[tile, c].reshape(TN, HW)
    # C == 3 (static), so this unrolls into three lane-dense (TN, HW) stores.
    for c in range(slab_ref.shape[0]):
        slab_ref[c, :, :] = x_ref[:, c, :]


def split_cat_forward(v1):
    """Pallas implementation of Model.forward.

    Returns (concatenated_tensor, (split0, split1, split2)).
    """
    N, C, H, W = v1.shape
    assert C == 3, "module splits dim=1 into [1, 1, 1] -> requires 3 channels"
    HW = H * W  # 256 for the 16x16 test input -> lane-dense (multiple of 128)

    # Lane-dense view: last dim is H*W instead of W.
    x3 = v1.reshape(N, C, HW)

    # Tile the batch axis. For small N a single full block; for large N use a
    # multiple-of-8 tile so the (sublane) constraint holds and DMA pipelines.
    TN = N if N <= 256 else 256
    grid = (pl.cdiv(N, TN),)

    slab = pl.pallas_call(
        _split_slab_kernel,
        out_shape=jax.ShapeDtypeStruct((C, N, HW), v1.dtype),
        grid=grid,
        in_specs=[pl.BlockSpec((TN, C, HW), lambda i: (i, 0, 0))],
        out_specs=pl.BlockSpec((C, TN, HW), lambda i: (0, i, 0)),
        compiler_params=pltpu.CompilerParams(
            dimension_semantics=("parallel",),
        ),
    )(x3)

    # split + cat along dim=1 with sizes [1,1,1] on a 3-channel tensor is an
    # exact identity -> return the input itself (JAX arrays are immutable).
    cat_out = v1

    # slab[c] is a contiguous (N, HW) chunk; reshape back to (N, 1, H, W).
    splits = tuple(slab[c].reshape(N, 1, H, W) for c in range(C))
    return cat_out, splits


def init_params(key):
    """Deterministic init of the (unused) Conv2d parameters from __init__.

    Two Sequentials, each with three Conv2d(3, 16, kernel=3, stride=1, pad=1).
    They are never used in forward(); materialized only for module parity.
    """
    params = []
    for _ in range(2):
        seq = []
        for _ in range(3):
            key, kw, kb = jax.random.split(key, 3)
            w = jax.random.normal(kw, (16, 3, 3, 3), dtype=jnp.float32) * 0.1
            b = jax.random.normal(kb, (16,), dtype=jnp.float32) * 0.1
            seq.append({"weight": w, "bias": b})
        params.append(seq)
    return params


if __name__ == "__main__":
    key = jax.random.PRNGKey(0)
    k_in, k_params = jax.random.split(key)

    # Small input consistent with the module: N=2, C=3 (required by split [1,1,1]), H=W=16
    v1 = jax.random.normal(k_in, (2, 3, 16, 16), dtype=jnp.float32)

    _ = init_params(k_params)  # unused by forward, kept for module parity

    cat_out, splits = split_cat_forward(v1)
    jax.block_until_ready(cat_out)
    for s in splits:
        jax.block_until_ready(s)

    # Sanity checks against the reference semantics
    assert cat_out.shape == v1.shape
    assert all(s.shape == (2, 1, 16, 16) for s in splits)
    assert jnp.allclose(cat_out, v1)
    assert jnp.allclose(splits[0], v1[:, 0:1])
    assert jnp.allclose(splits[1], v1[:, 1:2])
    assert jnp.allclose(splits[2], v1[:, 2:3])

    print("KERNEL_OK")
</pallas_src>

<mosaic_0001>
module attributes {stable_mosaic.version = 11 : i64} {
  func.func @_split_slab_kernel(%arg0: i32, %arg1: memref<2x3x256xf32, #tpu.memory_space<vmem>>, %arg2: memref<3x2x256xf32, #tpu.memory_space<vmem>>) attributes {dimension_semantics = [#tpu.dimension_semantics<parallel>], iteration_bounds = array<i64: 1>, scalar_prefetch = 0 : i64, scratch_operands = 0 : i64, tpu.core_type = #tpu.core_type<tc>, window_params = [{transform_indices = @transform_0, window_bounds = array<i64: 2, 3, 256>}, {transform_indices = @transform_1, window_bounds = array<i64: 3, 2, 256>}]} {
    %c0 = arith.constant 0 : index
    %c0_0 = arith.constant 0 : index
    %c0_1 = arith.constant 0 : index
    %0 = vector.load %arg1[%c0, %c0_0, %c0_1] : memref<2x3x256xf32, #tpu.memory_space<vmem>>, vector<2x1x256xf32>
    %1 = vector.shape_cast %0 : vector<2x1x256xf32> to vector<2x256xf32>
    %c0_2 = arith.constant 0 : index
    %c0_3 = arith.constant 0 : index
    %c0_4 = arith.constant 0 : index
    %2 = vector.load %arg2[%c0_2, %c0_3, %c0_4] : memref<3x2x256xf32, #tpu.memory_space<vmem>>, vector<1x2x256xf32>
    %3 = vector.shape_cast %2 : vector<1x2x256xf32> to vector<2x256xf32>
    %4 = vector.shape_cast %1 : vector<2x256xf32> to vector<1x2x256xf32>
    tpu.vector_store %arg2[%c0_2, %c0_3, %c0_4], %4 {strides = array<i32>} : memref<3x2x256xf32, #tpu.memory_space<vmem>>, vector<1x2x256xf32>,
    %c0_5 = arith.constant 0 : index
    %c1 = arith.constant 1 : index
    %c0_6 = arith.constant 0 : index
    %5 = vector.load %arg1[%c0_5, %c1, %c0_6] : memref<2x3x256xf32, #tpu.memory_space<vmem>>, vector<2x1x256xf32>
    %6 = vector.shape_cast %5 : vector<2x1x256xf32> to vector<2x256xf32>
    %c1_7 = arith.constant 1 : index
    %c0_8 = arith.constant 0 : index
    %c0_9 = arith.constant 0 : index
    %7 = vector.load %arg2[%c1_7, %c0_8, %c0_9] : memref<3x2x256xf32, #tpu.memory_space<vmem>>, vector<1x2x256xf32>
    %8 = vector.shape_cast %7 : vector<1x2x256xf32> to vector<2x256xf32>
    %9 = vector.shape_cast %6 : vector<2x256xf32> to vector<1x2x256xf32>
    tpu.vector_store %arg2[%c1_7, %c0_8, %c0_9], %9 {strides = array<i32>} : memref<3x2x256xf32, #tpu.memory_space<vmem>>, vector<1x2x256xf32>,
    %c0_10 = arith.constant 0 : index
    %c2 = arith.constant 2 : index
    %c0_11 = arith.constant 0 : index
    %10 = vector.load %arg1[%c0_10, %c2, %c0_11] : memref<2x3x256xf32, #tpu.memory_space<vmem>>, vector<2x1x256xf32>
    %11 = vector.shape_cast %10 : vector<2x1x256xf32> to vector<2x256xf32>
    %c2_12 = arith.constant 2 : index
    %c0_13 = arith.constant 0 : index
    %c0_14 = arith.constant 0 : index
    %12 = vector.load %arg2[%c2_12, %c0_13, %c0_14] : memref<3x2x256xf32, #tpu.memory_space<vmem>>, vector<1x2x256xf32>
    %13 = vector.shape_cast %12 : vector<1x2x256xf32> to vector<2x256xf32>
    %14 = vector.shape_cast %11 : vector<2x256xf32> to vector<1x2x256xf32>
    tpu.vector_store %arg2[%c2_12, %c0_13, %c0_14], %14 {strides = array<i32>} : memref<3x2x256xf32, #tpu.memory_space<vmem>>, vector<1x2x256xf32>,
    return
  }
  func.func @transform_0(%arg0: i32) -> (i32, i32, i32) {
    %c0_i32 = arith.constant 0 : i32
    %c0_i32_0 = arith.constant 0 : i32
    %c0_i32_1 = arith.constant 0 : i32
    return %arg0, %c0_i32, %c0_i32_0 : i32, i32, i32
  }
  func.func @transform_1(%arg0: i32) -> (i32, i32, i32) {
    %c0_i32 = arith.constant 0 : i32
    %c0_i32_0 = arith.constant 0 : i32
    %c0_i32_1 = arith.constant 0 : i32
    return %c0_i32, %arg0, %c0_i32_0 : i32, i32, i32
  }
}

</mosaic_0001>

<bundles_post_ra>
// kernel: tpu_custom_call.1
= control target key start
LH: loop header
LB: loop body
LE: loop exit
PB: predicated region body
PF: predicated region fallthrough
CT: control target
= control target key end

     0   :  { %s152_s0 = inlined_call_operand.vmem [shape: f32[2,3,256], index: 0, kind: input, shape index: {}]   ;;  %s153_s1 = inlined_call_operand.hbm [shape: f32[3,2,256], index: 1, kind: output, shape index: {}]  }
   0x1   :  { %v9_v0 = vld [vmem:[%s152_s0] ss:$4 sm:$0x3]  ;;  %v74_v1 = vld [vmem:[%s152_s0 + $0x8] ss:$4 sm:$0x3] }
   0x2   :  { %v14_v2 = vcombine.low %v9_v0, %v74_v1  ;;  %v76_v3 = vld [vmem:[%s152_s0 + $0x1] ss:$4 sm:$0x3]  ;;  %v77_v4 = vld [vmem:[%s152_s0 + $0x9] ss:$4 sm:$0x3] }
   0x3   :  { %v30_v5 = vcombine.low %v76_v3, %v77_v4  ;;  %v79_v6 = vld [vmem:[%s152_s0 + $0x2] ss:$4 sm:$0x3]  ;;  %v80_v7 = vld [vmem:[%s152_s0 + $0xa] ss:$4 sm:$0x3] }
   0x4   :  { %75 = vst.sshfl [vmem:[#allocation2] sm:$0x33 pattern:$0x75316420] %v14_v2  ;;  %v47_v8 = vcombine.low %v79_v6, %v80_v7 }
   0x5   :  { %6 = vsyncpa [#allocation3], 0  ;;  %78 = vst.sshfl [vmem:[#allocation2 + $0x4] sm:$0x33 pattern:$0x75316420] %v30_v5 }
   0x6   :  { %s109_s18 = smov [#allocation2]   ;;  %81 = vst.sshfl [vmem:[#allocation2 + $0x8] sm:$0x33 pattern:$0x75316420] %v47_v8 }
   0x7   :  { %s63_s19 = sshll.u32 %s109_s18, 4  ;;  %s64_s19 = int_to_ptr.vmem [resolvable:$true] %s63_s19 }
   0x8   :  { %s85_s20 = scalar_lea.vmem %s64_s19, 192  ;;  %p90_p1 = scmp.lt.s32.totalorder %s64_s19, %s64_s19 }
   0x9   :  { %p86_p0 = scmp.ne.s32.totalorder %s64_s19, %s85_s20  ;;  %p91_p2 = scmp.lt.s32.totalorder %s85_s20, %s85_s20 }
   0xb   :  { %p92_p3 = por %p91_p2, %p90_p1 }
   0xd   :  { %p93_p4 = pnand %p92_p3, %p86_p0 }
   0xf   :  { %96 = shalt.err (!%p93_p4)
}
  0x10   :  { %s97_s23 = scalar_lea.hbm %s153_s1, 192 }
  0x11   :  { %p98_p5 = scmp.ne.s32.totalorder %s153_s1, %s97_s23  ;;  %p101_p6 = scmp.lt.u32.totalorder %s97_s23, %s153_s1 }
  0x13   :  { %p103_p7 = pnand %p101_p6, %p98_p5 }
  0x15   :  { %106 = shalt.err (!%p103_p7)
}
  0x16   :  { %s110_s27 = smov 64   ;;  %s111_s28 = smov 4  }
  0x17   :  { %69 = dma.vmem_to_hbm [thread:$0]  %s64_s19, 192, %s153_s1, [#allocation3], %s110_s27, %s110_s27, %s111_s28  }
  0x18   :  { %107 = dma.done.wait [#allocation3], 192  }
  0x19   :  { %108 = vsyncadd [#allocation3], 4294967104 }
  0x1a   :  { %73 = vsyncpa [#allocation3], 1 }

</bundles_post_ra>
